<compile_context>
chip_gen: v7x
topology: tpu7x:2x2x1
jax: 0.10.0
libtpu: 0.0.40
codegen_flags: <defaults>
</compile_context>

<pallas_src>
import jax
import jax.numpy as jnp
from jax.experimental import pallas as pl
from jax.experimental.pallas import tpu as pltpu


def _make_attention_kernel(b_tile):
    def kernel(x_ref, w1_ref, b1_ref, w2_ref, b2_ref, o_ref):
        w1 = w1_ref[...]          # (Ch, C)  resident
        b1 = b1_ref[...]          # (Ch, 1)  broadcasts over lanes
        w2 = w2_ref[...]          # (C, Ch)  resident
        b2 = b2_ref[...]          # (C, 1)
        # Static (trace-time) loop over the batch sub-tile.  b_tile is capped
        # in the wrapper so this unroll stays small; each iteration is a pair
        # of lane-dense 2-D matmuls + an elementwise epilogue (no transposes).
        for b in range(b_tile):
            xb = x_ref[b]                                              # (C, T)
            h = jnp.dot(w1, xb, preferred_element_type=jnp.float32) + b1
            h = jnp.maximum(h, 0.0)                                    # (Ch, T)
            a = jnp.dot(w2, h, preferred_element_type=jnp.float32) + b2
            a = jax.nn.sigmoid(a)                                      # (C, T)
            o_ref[b] = (xb * a).astype(o_ref.dtype)
    return kernel


def attention_block(x_nchw, w1, b1, w2, b2, *,
                    target_block_bytes=2 * 1024 * 1024, max_b_tile=16):
    """x_nchw: (N, C, H, W).  w1: (C//8, C), b1: (C//8,), w2: (C, C//8), b2: (C,)."""
    N, C, H, W = x_nchw.shape
    Ch = w1.shape[0]
    HW = H * W
    itemsize = x_nchw.dtype.itemsize

    # Free metadata reshape: NCHW is already contiguous as (N, C, H*W).
    x3 = x_nchw.reshape(N, C, HW)

    # --- lane (spatial) tile -------------------------------------------------
    # Aim for ~target_block_bytes of x per grid step (HBM-bound op: >=1 MiB
    # blocks reach ~85% of roofline; 128 KiB blocks are per-step-overhead
    # bound).  Cap is derived from C so it adapts to the channel count.
    lane_cap = max(128, (target_block_bytes // (C * itemsize)) // 128 * 128)
    if HW <= lane_cap:
        tile_hw = HW          # full-extent lane block: always legal, <= target
    else:
        tile_hw = lane_cap    # multiple of 128; final block may be ragged
                              # (padded reads / masked writes — safe: no
                              #  cross-lane reduction in this kernel)

    # --- batch sub-tile ------------------------------------------------------
    # If one example's (C, tile_hw) slab is still small, batch several
    # examples per grid step to amortize the fixed per-step cost.
    per_batch_bytes = C * tile_hw * itemsize
    b_tile = int(max(1, min(N, max_b_tile,
                            target_block_bytes // per_batch_bytes)))

    grid = (pl.cdiv(N, b_tile), pl.cdiv(HW, tile_hw))

    # Column-vector biases so they broadcast across the lane (spatial) axis.
    b1c = b1.reshape(Ch, 1)
    b2c = b2.reshape(C, 1)

    out3 = pl.pallas_call(
        _make_attention_kernel(b_tile),
        out_shape=jax.ShapeDtypeStruct((N, C, HW), x_nchw.dtype),
        grid_spec=pltpu.PrefetchScalarGridSpec(
            num_scalar_prefetch=0,
            grid=grid,
            in_specs=[
                pl.BlockSpec((b_tile, C, tile_hw), lambda n, j: (n, 0, j)),  # x
                pl.BlockSpec((Ch, C), lambda n, j: (0, 0)),                  # w1
                pl.BlockSpec((Ch, 1), lambda n, j: (0, 0)),                  # b1
                pl.BlockSpec((C, Ch), lambda n, j: (0, 0)),                  # w2
                pl.BlockSpec((C, 1), lambda n, j: (0, 0)),                   # b2
            ],
            out_specs=pl.BlockSpec((b_tile, C, tile_hw), lambda n, j: (n, 0, j)),
        ),
        # Both grid axes are independent (no accumulator).  On v7x the leading
        # axis could additionally use pltpu.CORE_PARALLEL to shard across both
        # TensorCores; kept generation-neutral here.
        compiler_params=pltpu.CompilerParams(
            dimension_semantics=("parallel", "parallel"),
            vmem_limit_bytes=32 * 1024 * 1024),
    )(x3, w1, b1c, w2, b2c)

    return out3.reshape(N, C, H, W)


def reference(x, w1, b1, w2, b2):
    # Pure-JAX reference of the PyTorch forward, directly in NCHW.
    h = jnp.maximum(
        jnp.einsum("oc,nchw->nohw", w1, x) + b1[None, :, None, None], 0.0)
    a = jax.nn.sigmoid(
        jnp.einsum("co,nohw->nchw", w2, h) + b2[None, :, None, None])
    return x * a


if __name__ == "__main__":
    key = jax.random.PRNGKey(0)
    k_x, k_w1, k_b1, k_w2, k_b2, k_x2 = jax.random.split(key, 6)

    # Small shapes consistent with the module (in_channels must be >= 8).
    N, C, H, W = 2, 16, 16, 16            # hidden = C // 8 = 2
    Ch = C // 8

    x = jax.random.normal(k_x, (N, C, H, W), dtype=jnp.float32)
    # Parameters in PyTorch Conv2d (out, in) orientation (1x1 kernels squeezed).
    w1 = jax.random.normal(k_w1, (Ch, C), dtype=jnp.float32) * 0.1
    b1 = jax.random.normal(k_b1, (Ch,), dtype=jnp.float32) * 0.1
    w2 = jax.random.normal(k_w2, (C, Ch), dtype=jnp.float32) * 0.1
    b2 = jax.random.normal(k_b2, (C,), dtype=jnp.float32) * 0.1

    out = jax.block_until_ready(attention_block(x, w1, b1, w2, b2))
    ref = reference(x, w1, b1, w2, b2)
    assert out.shape == (N, C, H, W)
    assert jnp.allclose(out, ref, atol=1e-5, rtol=1e-5), "mismatch vs reference"

    # Extra check: non-128-divisible spatial extent and a ragged batch tile
    # (N % b_tile != 0) to exercise the padded-read / masked-store path.
    N2, H2, W2 = 3, 10, 20
    x2 = jax.random.normal(k_x2, (N2, C, H2, W2), dtype=jnp.float32)
    out2 = jax.block_until_ready(
        attention_block(x2, w1, b1, w2, b2, max_b_tile=2))
    ref2 = reference(x2, w1, b1, w2, b2)
    assert jnp.allclose(out2, ref2, atol=1e-5, rtol=1e-5), "ragged-case mismatch"

    print("KERNEL_OK")
</pallas_src>

<mosaic_0001>
module attributes {stable_mosaic.version = 11 : i64} {
  func.func @kernel(%arg0: i32, %arg1: i32, %arg2: memref<2x16x256xf32, #tpu.memory_space<vmem>>, %arg3: memref<2x16xf32, #tpu.memory_space<vmem>>, %arg4: memref<2x1xf32, #tpu.memory_space<vmem>>, %arg5: memref<16x2xf32, #tpu.memory_space<vmem>>, %arg6: memref<16x1xf32, #tpu.memory_space<vmem>>, %arg7: memref<2x16x256xf32, #tpu.memory_space<vmem>>) attributes {dimension_semantics = [#tpu.dimension_semantics<parallel>, #tpu.dimension_semantics<parallel>], iteration_bounds = array<i64: 1, 1>, scalar_prefetch = 0 : i64, scratch_operands = 0 : i64, tpu.core_type = #tpu.core_type<tc>, window_params = [{transform_indices = @transform_0, window_bounds = array<i64: 2, 16, 256>}, {pipeline_mode = #tpu.pipeline_mode<synchronous>, transform_indices = @transform_1, window_bounds = array<i64: 2, 16>}, {pipeline_mode = #tpu.pipeline_mode<synchronous>, transform_indices = @transform_2, window_bounds = array<i64: 2, 1>}, {pipeline_mode = #tpu.pipeline_mode<synchronous>, transform_indices = @transform_3, window_bounds = array<i64: 16, 2>}, {pipeline_mode = #tpu.pipeline_mode<synchronous>, transform_indices = @transform_4, window_bounds = array<i64: 16, 1>}, {transform_indices = @transform_5, window_bounds = array<i64: 2, 16, 256>}]} {
    %c0 = arith.constant 0 : index
    %c0_0 = arith.constant 0 : index
    %0 = vector.load %arg3[%c0, %c0_0] : memref<2x16xf32, #tpu.memory_space<vmem>>, vector<2x16xf32>
    %c0_1 = arith.constant 0 : index
    %c0_2 = arith.constant 0 : index
    %1 = vector.load %arg4[%c0_1, %c0_2] : memref<2x1xf32, #tpu.memory_space<vmem>>, vector<2x1xf32>
    %c0_3 = arith.constant 0 : index
    %c0_4 = arith.constant 0 : index
    %2 = vector.load %arg5[%c0_3, %c0_4] : memref<16x2xf32, #tpu.memory_space<vmem>>, vector<16x2xf32>
    %c0_5 = arith.constant 0 : index
    %c0_6 = arith.constant 0 : index
    %3 = vector.load %arg6[%c0_5, %c0_6] : memref<16x1xf32, #tpu.memory_space<vmem>>, vector<16x1xf32>
    %c0_7 = arith.constant 0 : index
    %c0_8 = arith.constant 0 : index
    %c0_9 = arith.constant 0 : index
    %4 = vector.load %arg2[%c0_7, %c0_8, %c0_9] : memref<2x16x256xf32, #tpu.memory_space<vmem>>, vector<1x16x256xf32>
    %5 = vector.shape_cast %4 : vector<1x16x256xf32> to vector<16x256xf32>
    %cst = arith.constant dense<0.000000e+00> : vector<2x256xf32>
    %6 = tpu.matmul %0, %5, %cst {dimension_numbers = #tpu.dot_dimension_numbers<[1], [0], [0], [1], [0, 0, 1, 1], [], []>} : vector<2x16xf32>, vector<16x256xf32>, vector<2x256xf32> -> vector<2x256xf32>
    %7 = vector.broadcast %1 : vector<2x1xf32> to vector<2x256xf32>
    %8 = arith.addf %6, %7 : vector<2x256xf32>
    %cst_10 = arith.constant 0.000000e+00 : f32
    %9 = vector.broadcast %cst_10 : f32 to vector<2x256xf32>
    %10 = arith.maximumf %8, %9 : vector<2x256xf32>
    %cst_11 = arith.constant dense<0.000000e+00> : vector<16x256xf32>
    %11 = tpu.matmul %2, %10, %cst_11 {dimension_numbers = #tpu.dot_dimension_numbers<[1], [0], [0], [1], [0, 0, 1, 1], [], []>} : vector<16x2xf32>, vector<2x256xf32>, vector<16x256xf32> -> vector<16x256xf32>
    %12 = vector.broadcast %3 : vector<16x1xf32> to vector<16x256xf32>
    %13 = arith.addf %11, %12 : vector<16x256xf32>
    %14 = arith.negf %13 : vector<16x256xf32>
    %15 = math.exp %14 : vector<16x256xf32>
    %cst_12 = arith.constant 1.000000e+00 : f32
    %16 = vector.broadcast %cst_12 : f32 to vector<16x256xf32>
    %17 = arith.addf %16, %15 : vector<16x256xf32>
    %18 = arith.divf %16, %17 : vector<16x256xf32>
    %19 = arith.mulf %5, %18 : vector<16x256xf32>
    %c0_13 = arith.constant 0 : index
    %c0_14 = arith.constant 0 : index
    %c0_15 = arith.constant 0 : index
    %20 = vector.load %arg7[%c0_13, %c0_14, %c0_15] : memref<2x16x256xf32, #tpu.memory_space<vmem>>, vector<1x16x256xf32>
    %21 = vector.shape_cast %20 : vector<1x16x256xf32> to vector<16x256xf32>
    %22 = vector.shape_cast %19 : vector<16x256xf32> to vector<1x16x256xf32>
    tpu.vector_store %arg7[%c0_13, %c0_14, %c0_15], %22 {strides = array<i32>} : memref<2x16x256xf32, #tpu.memory_space<vmem>>, vector<1x16x256xf32>,
    %c1 = arith.constant 1 : index
    %c0_16 = arith.constant 0 : index
    %c0_17 = arith.constant 0 : index
    %23 = vector.load %arg2[%c1, %c0_16, %c0_17] : memref<2x16x256xf32, #tpu.memory_space<vmem>>, vector<1x16x256xf32>
    %24 = vector.shape_cast %23 : vector<1x16x256xf32> to vector<16x256xf32>
    %cst_18 = arith.constant dense<0.000000e+00> : vector<2x256xf32>
    %25 = tpu.matmul %0, %24, %cst_18 {dimension_numbers = #tpu.dot_dimension_numbers<[1], [0], [0], [1], [0, 0, 1, 1], [], []>} : vector<2x16xf32>, vector<16x256xf32>, vector<2x256xf32> -> vector<2x256xf32>
    %26 = vector.broadcast %1 : vector<2x1xf32> to vector<2x256xf32>
    %27 = arith.addf %25, %26 : vector<2x256xf32>
    %cst_19 = arith.constant 0.000000e+00 : f32
    %28 = vector.broadcast %cst_19 : f32 to vector<2x256xf32>
    %29 = arith.maximumf %27, %28 : vector<2x256xf32>
    %cst_20 = arith.constant dense<0.000000e+00> : vector<16x256xf32>
    %30 = tpu.matmul %2, %29, %cst_20 {dimension_numbers = #tpu.dot_dimension_numbers<[1], [0], [0], [1], [0, 0, 1, 1], [], []>} : vector<16x2xf32>, vector<2x256xf32>, vector<16x256xf32> -> vector<16x256xf32>
    %31 = vector.broadcast %3 : vector<16x1xf32> to vector<16x256xf32>
    %32 = arith.addf %30, %31 : vector<16x256xf32>
    %33 = arith.negf %32 : vector<16x256xf32>
    %34 = math.exp %33 : vector<16x256xf32>
    %cst_21 = arith.constant 1.000000e+00 : f32
    %35 = vector.broadcast %cst_21 : f32 to vector<16x256xf32>
    %36 = arith.addf %35, %34 : vector<16x256xf32>
    %37 = arith.divf %35, %36 : vector<16x256xf32>
    %38 = arith.mulf %24, %37 : vector<16x256xf32>
    %c1_22 = arith.constant 1 : index
    %c0_23 = arith.constant 0 : index
    %c0_24 = arith.constant 0 : index
    %39 = vector.load %arg7[%c1_22, %c0_23, %c0_24] : memref<2x16x256xf32, #tpu.memory_space<vmem>>, vector<1x16x256xf32>
    %40 = vector.shape_cast %39 : vector<1x16x256xf32> to vector<16x256xf32>
    %41 = vector.shape_cast %38 : vector<16x256xf32> to vector<1x16x256xf32>
    tpu.vector_store %arg7[%c1_22, %c0_23, %c0_24], %41 {strides = array<i32>} : memref<2x16x256xf32, #tpu.memory_space<vmem>>, vector<1x16x256xf32>,
    return
  }
  func.func @transform_0(%arg0: i32, %arg1: i32) -> (i32, i32, i32) {
    %c0_i32 = arith.constant 0 : i32
    %c0_i32_0 = arith.constant 0 : i32
    return %arg0, %c0_i32, %arg1 : i32, i32, i32
  }
  func.func @transform_1(%arg0: i32, %arg1: i32) -> (i32, i32) {
    %c0_i32 = arith.constant 0 : i32
    %c0_i32_0 = arith.constant 0 : i32
    %c0_i32_1 = arith.constant 0 : i32
    return %c0_i32, %c0_i32_0 : i32, i32
  }
  func.func @transform_2(%arg0: i32, %arg1: i32) -> (i32, i32) {
    %c0_i32 = arith.constant 0 : i32
    %c0_i32_0 = arith.constant 0 : i32
    %c0_i32_1 = arith.constant 0 : i32
    return %c0_i32, %c0_i32_0 : i32, i32
  }
  func.func @transform_3(%arg0: i32, %arg1: i32) -> (i32, i32) {
    %c0_i32 = arith.constant 0 : i32
    %c0_i32_0 = arith.constant 0 : i32
    %c0_i32_1 = arith.constant 0 : i32
    return %c0_i32, %c0_i32_0 : i32, i32
  }
  func.func @transform_4(%arg0: i32, %arg1: i32) -> (i32, i32) {
    %c0_i32 = arith.constant 0 : i32
    %c0_i32_0 = arith.constant 0 : i32
    %c0_i32_1 = arith.constant 0 : i32
    return %c0_i32, %c0_i32_0 : i32, i32
  }
  func.func @transform_5(%arg0: i32, %arg1: i32) -> (i32, i32, i32) {
    %c0_i32 = arith.constant 0 : i32
    %c0_i32_0 = arith.constant 0 : i32
    return %arg0, %c0_i32, %arg1 : i32, i32, i32
  }
}

</mosaic_0001>

<bundles_post_ra>
// kernel: tpu_custom_call.1
= control target key start
LH: loop header
LB: loop body
LE: loop exit
PB: predicated region body
PF: predicated region fallthrough
CT: control target
= control target key end

     0   :  { %10 = vsyncpa [#allocation3], 0  ;;  %s721_s0 = inlined_call_operand.hbm [shape: f32[2,16,256], index: 0, kind: input, shape index: {}]   ;;  %s722_s1 = inlined_call_operand.vmem [shape: f32[2,16], index: 1, kind: input, shape index: {}]   ;;  %s723_s2 = inlined_call_operand.vmem [shape: f32[2,1], index: 2, kind: input, shape index: {}]   ;;  %s724_s3 = inlined_call_operand.vmem [shape: f32[16,2], index: 3, kind: input, shape index: {}]   ;;  %s725_s4 = inlined_call_operand.vmem [shape: f32[16,1], index: 4, kind: input, shape index: {}]   ;;  %s726_s5 = inlined_call_operand.hbm [shape: f32[2,16,256], index: 5, kind: output, shape index: {}]  }
   0x1   :  { %11 = vsyncpa [#allocation4], 0  ;;  %s587_s18 = smov [#allocation2]   ;;  %s539_s22 = scalar_lea.hbm %s721_s0, 1024 }
   0x2   :  { %s17_s19 = sshll.u32 %s587_s18, 4  ;;  %p540_p0 = scmp.ne.s32.totalorder %s721_s0, %s539_s22  ;;  %s18_s19 = int_to_ptr.vmem [resolvable:$true] %s17_s19 }
   0x3   :  { %p543_p1 = scmp.lt.u32.totalorder %s539_s22, %s721_s0 }
   0x5   :  { %p545_p2 = pnand %p543_p1, %p540_p0 }
   0x7   :  { %548 = shalt.err (!%p545_p2)
}
   0x8   :  { %s549_s27 = scalar_lea.vmem %s18_s19, 1024  ;;  %p554_p4 = scmp.lt.s32.totalorder %s18_s19, %s18_s19 }
   0x9   :  { %p550_p3 = scmp.ne.s32.totalorder %s18_s19, %s549_s27  ;;  %p555_p5 = scmp.lt.s32.totalorder %s549_s27, %s549_s27 }
   0xb   :  { %p556_p6 = por %p555_p5, %p554_p4 }
   0xd   :  { %p557_p7 = pnand %p556_p6, %p550_p3 }
   0xf   :  { %560 = shalt.err (!%p557_p7)
}
  0x10   :  { %s588_s28 = smov 256   ;;  %s589_s29 = smov 16  }
  0x11   :  { %23 = dma.hbm_to_vmem [thread:$0]  %s721_s0, 1024, %s18_s19, [#allocation3], %s588_s28, %s588_s28, %s589_s29  }
  0x12   :  { %583 = dma.done.wait [#allocation3], 1024  }
  0x13   :  { %584 = vsyncadd [#allocation3], 4294966272  ;;  %v590_v0 = vmov 0.0   ;;  %v591_v1 = vmov 0   ;;  %v640_v2 = vld [vmem:[#allocation2 + $0x8] sm:$0xff]  ;;  %v642_v3 = vld [vmem:[#allocation2 + $0x18] sm:$0xff] }
  0x14   :  { %118 = vmatprep.mubr.f32.mxu0 %v590_v0  ;;  %505 = vset.pattern.permute.xlu0 %v591_v1  ;;  %v644_v4 = vld [vmem:[#allocation2] sm:$0xff]  ;;  %v489_v5 = vpack.c.bf16 %v642_v3, %v640_v2  ;;  %v648_v6 = vld [vmem:[#allocation2 + $0x10] sm:$0xff]  ;;  %vm50_vm0 = vcmask 130048   ;;  %v663_v15 = vld [vmem:[#allocation2 + $0x28] sm:$0xff]  ;;  %vm144_vm1 = vcmask 1041408   ;;  %vm137_vm2 = vcmask 15360  }
  0x15   :  { %221 = vmatprep.mubr.f32.mxu1 %v590_v0  ;;  %506 = vset.pattern.permute.xlu1 %v591_v1  ;;  %v36_v7 = vld [vmem:[%s723_s2] sm:$0x3]  ;;  %v491_v8 = vpack.c.bf16 %v648_v6, %v644_v4  ;;  %v665_v16 = vld [vmem:[#allocation2 + $0x38] sm:$0xff]  ;;  %v669_v19 = vld [vmem:[#allocation2 + $0x30] sm:$0xff] }
  0x16   :  { %47 = vperm.xlu0 %505, %v36_v7   ;;  %490 = vmatprep.subr.bf16.mxu0 %v489_v5  ;;  %v39_v9 = vld [vmem:[%s725_s4] sm:$0xff]  ;;  %v493_v21 = vpack.c.bf16 %v665_v16, %v663_v15  ;;  %v38_v25 = vld [vmem:[%s724_s3 + $0x8] sm:$0xff] }
  0x17   :  { %492 = vmatpush1.bf16.msra.mxu0 %v491_v8  ;;  %v35_v10 = vld [vmem:[%s722_s1] sm:$0x3]  ;;  %v40_v26 = vld [vmem:[%s725_s4 + $0x8] sm:$0xff] }
  0x18   :  { %v667_v18 = vld [vmem:[#allocation2 + $0x20] sm:$0xff]  ;;  %134 = vperm.xlu1 %506, %v40_v26  }
  0x19   :  { %v37_v23 = vld [vmem:[%s724_s3] sm:$0xff]  ;;  %v495_v24 = vpack.c.bf16 %v669_v19, %v667_v18  ;;  %s592_s3 = smov [#allocation5]  }
  0x1a   :  { %129 = vperm.xlu0 %505, %v39_v9   ;;  %471 = vmatmul.mubr.msk.f32.vlgmr.msra.gmra.mrb[0].mxu0 %vm50_vm0, %v35_v10  ;;  %s459_s4 = sshll.u32 %s592_s3, 4  ;;  %s460_s4 = int_to_ptr.vmem [resolvable:$true] %s459_s4 }
  0x1b   :  { %215 = vmatprep.mubr.f32.mxu0 %v590_v0  ;;  %s561_s16 = scalar_lea.vmem %s460_s4, 1024  ;;  %p566_p9 = scmp.lt.s32.totalorder %s460_s4, %s460_s4 }
  0x1c   :  { %p562_p8 = scmp.ne.s32.totalorder %s460_s4, %s561_s16  ;;  %p567_p10 = scmp.lt.s32.totalorder %s561_s16, %s561_s16 }
  0x1e   :  { %p568_p11 = por %p567_p10, %p566_p9 }
  0x20   :  { %p569_p12 = pnand %p568_p11, %p562_p8 }
  0x95   :  { %v48_v11 = vpop.permute.xlu0 %47 }
  0x97   :  { %v135_v48 = vpop.permute.xlu1 %134 }
  0x99   :  { %v130_v27 = vpop.permute.xlu0 %129 }
  0xed   :  { %v120_v12 = vpop.f32.mrb[0].mxu0 }
  0xee   :  { %v121_v13 = vadd.f32 %v120_v12, %v48_v11  ;;  %v122_v14 = vpop.f32.mrb[1].mxu0 }
  0xef   :  { %v123_v17 = vadd.f32 %v122_v14, %v48_v11 }
  0xf0   :  { %v125_v22 = vmax.f32 %v121_v13, 0.0 }
  0xf1   :  { %v126_v20 = vmax.f32 %v123_v17, 0.0 }
  0xf3   :  { %472 = vmatprep.subr.msk.mxu0 %vm144_vm1, %v126_v20  ;;  %497 = vmatprep.subr.msk.mxu1 %vm144_vm1, %v126_v20 }
  0xf4   :  { %473 = vmatpush1.msk.msra.mxu0 %vm144_vm1, %v125_v22  ;;  %498 = vmatpush1.msk.msra.mxu1 %vm144_vm1, %v125_v22 }
  0xf5   :  { %474 = vmatmul.mubr.msk.f32.vlgmr.msra.gmra.mrb[2].mxu0 %vm137_vm2, %v37_v23  ;;  %494 = vmatprep.subr.bf16.mxu0 %v493_v21 }
  0xf6   :  { %496 = vmatpush1.bf16.msra.mxu0 %v495_v24  ;;  %329 = vmatprep.mubr.f32.mxu0 %v590_v0 }
  0xf7   :  { %475 = vmatmul.mubr.msk.f32.vlgmr.msra.gmra.mrb[0].mxu1 %vm137_vm2, %v38_v25 }
  0xf8   :  { %408 = vmatprep.mubr.f32.mxu1 %v590_v0 }
  0xf9   :  { %480 = vmatmul.mubr.msk.f32.vlgmr.msra.gmra.mrb[4].mxu0 %vm50_vm0, %v35_v10 }
 0x1c8   :  { %v217_v28 = vpop.f32.mrb[2].mxu0 }
 0x1c9   :  { %v218_v29 = vadd.f32 %v217_v28, %v130_v27  ;;  %v219_v30 = vpop.f32.mrb[3].mxu0 }
 0x1ca   :  { %v220_v31 = vadd.f32 %v219_v30, %v130_v27  ;;  %v223_v49 = vpop.f32.mrb[0].mxu1 }
 0x1cb   :  { %v476_v32 = vmul.f32 -1.442695, %v218_v29  ;;  %v224_v50 = vadd.f32 %v223_v49, %v135_v48  ;;  %v225_v51 = vpop.f32.mrb[1].mxu1 }
 0x1cc   :  { %v477_v33 = vmul.f32 -1.442695, %v220_v31  ;;  %v331_v34 = vpop.f32.mrb[4].mxu0  ;;  %v226_v52 = vadd.f32 %v225_v51, %v135_v48 }
 0x1cd   :  { %507 = vpow2.f32 %v476_v32  ;;  %v332_v35 = vadd.f32 %v331_v34, %v48_v11  ;;  %v333_v36 = vpop.f32.mrb[5].mxu0  ;;  %v478_v53 = vmul.f32 -1.442695, %v224_v50 }
 0x1ce   :  { %509 = vpow2.f32 %v477_v33  ;;  %v334_v37 = vadd.f32 %v333_v36, %v48_v11  ;;  %v479_v54 = vmul.f32 -1.442695, %v226_v52 }
 0x1cf   :  { %v336_v39 = vmax.f32 %v332_v35, 0.0 }
 0x1d0   :  { %v337_v38 = vmax.f32 %v334_v37, 0.0 }
 0x1d2   :  { %481 = vmatprep.subr.msk.mxu1 %vm144_vm1, %v337_v38 }
 0x1d3   :  { %482 = vmatpush1.msk.msra.mxu1 %vm144_vm1, %v336_v39 }
 0x1d4   :  { %483 = vmatmul.mubr.msk.f32.vlgmr.msra.gmra.mrb[2].mxu1 %vm137_vm2, %v37_v23 }
 0x1d5   :  { %414 = vmatprep.mubr.f32.mxu1 %v590_v0 }
 0x1d7   :  { %v508_v40 = vpop.eup %507 }
 0x1d8   :  { %v510_v41 = vpop.eup %509  ;;  %v240_v42 = vadd.f32 1.0, %v508_v40  ;;  %484 = vmatmul.mubr.msk.f32.gmra.mrb[4].mxu1 %vm137_vm2, %v38_v25 }
 0x1d9   :  { %v241_v43 = vadd.f32 1.0, %v510_v41 }
 0x1da   :  { %511 = vrcp.f32 %v240_v42 }
 0x1db   :  { %513 = vrcp.f32 %v241_v43 }
 0x1dc   :  { %515 = vpow2.f32 %v478_v53 }
 0x1dd   :  { %517 = vpow2.f32 %v479_v54 }
 0x1e4   :  { %v512_v44 = vpop.eup %511 }
 0x1e5   :  { %v514_v45 = vpop.eup %513  ;;  %v252_v46 = vmul.f32 %v512_v44, %v644_v4 }
 0x1e6   :  { %v253_v47 = vmul.f32 %v514_v45, %v640_v2  ;;  %v516_v55 = vpop.eup %515 }
 0x1e7   :  { %256 = vst [vmem:[#allocation5] sm:$0xff] %v252_v46  ;;  %v518_v56 = vpop.eup %517  ;;  %v242_v57 = vadd.f32 1.0, %v516_v55 }
 0x1e8   :  { %257 = vst [vmem:[#allocation5 + $0x8] sm:$0xff] %v253_v47  ;;  %v243_v58 = vadd.f32 1.0, %v518_v56 }
 0x1e9   :  { %519 = vrcp.f32 %v242_v57 }
 0x1ea   :  { %521 = vrcp.f32 %v243_v58 }
 0x1f3   :  { %v520_v59 = vpop.eup %519 }
 0x1f4   :  { %v522_v60 = vpop.eup %521  ;;  %v254_v61 = vmul.f32 %v520_v59, %v648_v6 }
 0x1f5   :  { %v255_v62 = vmul.f32 %v522_v60, %v642_v3 }
 0x1f6   :  { %258 = vst [vmem:[#allocation5 + $0x10] sm:$0xff] %v254_v61 }
 0x1f7   :  { %259 = vst [vmem:[#allocation5 + $0x18] sm:$0xff] %v255_v62 }
 0x2a7   :  { %v410_v63 = vpop.f32.mrb[2].mxu1 }
 0x2a8   :  { %v411_v0 = vadd.f32 %v410_v63, %v130_v27  ;;  %v412_v1 = vpop.f32.mrb[3].mxu1 }
 0x2a9   :  { %v413_v2 = vadd.f32 %v412_v1, %v130_v27 }
 0x2aa   :  { %v485_v4 = vmul.f32 -1.442695, %v411_v0 }
 0x2ab   :  { %v486_v5 = vmul.f32 -1.442695, %v413_v2  ;;  %v416_v7 = vpop.f32.mrb[4].mxu1 }
 0x2ac   :  { %523 = vpow2.f32 %v485_v4  ;;  %v417_v8 = vadd.f32 %v416_v7, %v135_v48  ;;  %v418_v9 = vpop.f32.mrb[5].mxu1 }
 0x2ad   :  { %525 = vpow2.f32 %v486_v5  ;;  %v419_v10 = vadd.f32 %v418_v9, %v135_v48 }
 0x2ae   :  { %v487_v11 = vmul.f32 -1.442695, %v417_v8 }
 0x2af   :  { %v488_v12 = vmul.f32 -1.442695, %v419_v10 }
 0x2b0   :  { %527 = vpow2.f32 %v487_v11 }
 0x2b1   :  { %529 = vpow2.f32 %v488_v12 }
 0x2b6   :  { %v524_v6 = vpop.eup %523 }
 0x2b7   :  { %v526_v3 = vpop.eup %525  ;;  %v433_v13 = vadd.f32 1.0, %v524_v6 }
 0x2b8   :  { %v434_v14 = vadd.f32 1.0, %v526_v3 }
 0x2b9   :  { %531 = vrcp.f32 %v433_v13 }
 0x2ba   :  { %v528_v17 = vpop.eup %527  ;;  %533 = vrcp.f32 %v434_v14 }
 0x2bb   :  { %v530_v20 = vpop.eup %529  ;;  %v435_v21 = vadd.f32 1.0, %v528_v17 }
 0x2bc   :  { %v436_v22 = vadd.f32 1.0, %v530_v20 }
 0x2bd   :  { %535 = vrcp.f32 %v435_v21 }
 0x2be   :  { %537 = vrcp.f32 %v436_v22 }
 0x2c3   :  { %v532_v23 = vpop.eup %531 }
 0x2c4   :  { %v534_v24 = vpop.eup %533  ;;  %v445_v25 = vmul.f32 %v532_v23, %v667_v18 }
 0x2c5   :  { %v446_v26 = vmul.f32 %v534_v24, %v663_v15 }
 0x2c6   :  { %450 = vst [vmem:[#allocation5 + $0x20] sm:$0xff] %v445_v25 }
 0x2c7   :  { %v536_v27 = vpop.eup %535  ;;  %451 = vst [vmem:[#allocation5 + $0x28] sm:$0xff] %v446_v26 }
 0x2c8   :  { %v538_v28 = vpop.eup %537  ;;  %v447_v29 = vmul.f32 %v536_v27, %v669_v19 }
 0x2c9   :  { %v448_v30 = vmul.f32 %v538_v28, %v665_v16 }
 0x2ca   :  { %452 = vst [vmem:[#allocation5 + $0x30] sm:$0xff] %v447_v29 }
 0x2cb   :  { %453 = vst [vmem:[#allocation5 + $0x38] sm:$0xff] %v448_v30 }
 0x2cc   :  { %572 = shalt.err (!%p569_p12)
}
 0x2cd   :  { %s573_s19 = scalar_lea.hbm %s726_s5, 1024 }
 0x2ce   :  { %p574_p13 = scmp.ne.s32.totalorder %s726_s5, %s573_s19  ;;  %p577_p0 = scmp.lt.u32.totalorder %s573_s19, %s726_s5 }
 0x2d0   :  { %p579_p1 = pnand %p577_p0, %p574_p13 }
 0x2d2   :  { %582 = shalt.err (!%p579_p1)
}
 0x2d3   :  { %465 = dma.vmem_to_hbm [thread:$0]  %s460_s4, 1024, %s726_s5, [#allocation4], %s588_s28, %s588_s28, %s589_s29  }
 0x2d4   :  { %585 = dma.done.wait [#allocation4], 1024  }
 0x2d5   :  { %586 = vsyncadd [#allocation4], 4294966272 }
 0x2d6   :  { %469 = vsyncpa [#allocation3], 1 }
 0x2d7   :  { %470 = vsyncpa [#allocation4], 1 }

</bundles_post_ra>
